<compile_context>
chip_gen: v6e
topology: v6e:2x2x1
jax: 0.10.0
libtpu: 0.0.40
codegen_flags: <defaults>
</compile_context>

<pallas_src>
import jax
import jax.numpy as jnp
from jax import lax
from jax.experimental import pallas as pl
from jax.experimental.pallas import tpu as pltpu


# ----------------------------------------------------------------------------
# VMEM budgeting / chunk selection
# ----------------------------------------------------------------------------
def _vmem_budget_bytes():
    """Per-generation VMEM budget (3/4 of capacity); v7x-safe fallback."""
    try:
        info = pltpu.get_tpu_info()
        for name in ("vmem_capacity_bytes", "vmem_size_bytes", "vmem_bytes"):
            cap = getattr(info, name, None)
            if cap:
                return int(cap) * 3 // 4
    except Exception:
        pass
    return 48 << 20  # safe on v7x (64 MiB physical); conservative on v5e/v6e


def _pick_chunk(T, Bp, H, budget, max_chunk):
    """Largest T-chunk whose double-buffered zx+out blocks fit ~half the budget."""
    per_step = 4 * 2 * Bp * (8 * H + 2 * H)           # f32, double-buffered zx + out rows
    fixed = 4 * (2 * (2 * H) * (8 * H) + 8 * Bp * 2 * H)
    avail = max(budget // 2 - fixed, per_step)
    return int(max(1, min(T, avail // per_step, max_chunk)))


# ----------------------------------------------------------------------------
# Kernel factory: fused bidirectional LSTM recurrence over one T-chunk per grid step.
# ----------------------------------------------------------------------------
def _make_bilstm_kernel(TC, Bp, H, T_real, NC):
    G = 2 * H                                   # fused [fwd | bwd] band width
    needs_mask = (NC * TC != T_real)            # True only when T was padded
    unroll = TC if (TC <= 16 and H <= 64) else min(TC, 4)

    def kernel(zx_ref, h0_ref, c0_ref, whh_ref, out_ref, hn_ref, cn_ref, h_s, c_s):
        c = pl.program_id(0)

        @pl.when(c == 0)
        def _():
            h_s[...] = h0_ref[...]
            c_s[...] = c0_ref[...]

        # loop-invariant block-diagonal recurrent weight, hoisted out of the loop.
        whh = whh_ref[...]                      # (2H, 8H)
        base = c * TC

        def step(i, carry):
            h, cc = carry
            r = pl.multiple_of(i * Bp, Bp)
            # One MXU matmul per step for BOTH directions (block-diag fusion).
            z = zx_ref[pl.ds(r, Bp), :] + jnp.dot(
                h, whh, preferred_element_type=jnp.float32)      # (Bp, 8H)
            # Gate-interleaved layout -> contiguous bands, few wide EUP pushes:
            #   [0:2G) = i|f (one sigmoid), [2G:3G) = g (tanh), [3G:4G) = o (sigmoid).
            sif = jax.nn.sigmoid(z[:, 0:2 * G])
            i_g = sif[:, 0:G]
            f_g = sif[:, G:2 * G]
            g_g = jnp.tanh(z[:, 2 * G:3 * G])
            o_g = jax.nn.sigmoid(z[:, 3 * G:4 * G])
            c_new = f_g * cc + i_g * g_g
            h_new = o_g * jnp.tanh(c_new)
            if needs_mask:                      # emitted only when T is padded
                valid = (base + i) < T_real
                h_new = jnp.where(valid, h_new, h)
                c_new = jnp.where(valid, c_new, cc)
            out_ref[pl.ds(r, Bp), :] = h_new    # single lane-dense (Bp, 2H) store
            return (h_new, c_new)

        h, cc = lax.fori_loop(0, TC, step, (h_s[...], c_s[...]), unroll=unroll)

        # carry state to the next chunk.
        h_s[...] = h
        c_s[...] = cc

        # final states only on the last chunk (saves vst slots on every other step).
        @pl.when(c == NC - 1)
        def _():
            hn_ref[...] = h
            cn_ref[...] = cc

    return kernel


def _bilstm_recurrence(zx, h0c, c0c, whh, *, T_real, Tpad, TC, Bp, H, budget):
    NC = Tpad // TC
    G = 2 * H
    rows = TC * Bp
    f32 = jnp.float32

    def full(shape):
        return pl.BlockSpec(shape, lambda c: (0,) * len(shape))

    grid_spec = pltpu.PrefetchScalarGridSpec(
        num_scalar_prefetch=0,
        grid=(NC,),
        in_specs=[
            pl.BlockSpec((rows, 8 * H), lambda c: (c, 0)),   # precomputed zx, fused layout
            full((Bp, G)),                                   # h0 fused [h_f | h_b]
            full((Bp, G)),                                   # c0 fused
            full((G, 8 * H)),                                # block-diag W_hh
        ],
        out_specs=[
            pl.BlockSpec((rows, G), lambda c: (c, 0)),       # fused output per chunk
            full((Bp, G)),                                   # h_n fused
            full((Bp, G)),                                   # c_n fused
        ],
        scratch_shapes=[
            pltpu.VMEM((Bp, G), f32),                        # h carry
            pltpu.VMEM((Bp, G), f32),                        # c carry
        ],
    )

    # per-block footprint (double-buffered streamed blocks + constants + scratch)
    est = 4 * (2 * rows * 8 * H + 2 * rows * G
               + 2 * (G * 8 * H) + 8 * Bp * G)
    vmem_limit = int(min(budget, max(2 * est, 32 << 20)))

    out_shapes = (
        jax.ShapeDtypeStruct((Tpad * Bp, G), f32),
        jax.ShapeDtypeStruct((Bp, G), f32),
        jax.ShapeDtypeStruct((Bp, G), f32),
    )

    return pl.pallas_call(
        _make_bilstm_kernel(TC, Bp, H, T_real, NC),
        out_shape=out_shapes,
        grid_spec=grid_spec,
        compiler_params=pltpu.CompilerParams(
            dimension_semantics=("arbitrary",),
            vmem_limit_bytes=vmem_limit,
        ),
    )(zx, h0c, c0c, whh)


# ----------------------------------------------------------------------------
# Parameter construction (mirrors nn.Embedding + nn.LSTM shapes).
# ----------------------------------------------------------------------------
def init_params(key, vocab_size, embedding_dim, nhidden):
    ks = jax.random.split(key, 9)
    k = 1.0 / jnp.sqrt(nhidden)
    u = lambda kk, shape: jax.random.uniform(kk, shape, jnp.float32, -k, k)
    return {
        "embedding": jax.random.normal(ks[0], (vocab_size, embedding_dim), jnp.float32),
        "w_ih_f": u(ks[1], (4 * nhidden, embedding_dim)),
        "w_hh_f": u(ks[2], (4 * nhidden, nhidden)),
        "b_ih_f": u(ks[3], (4 * nhidden,)),
        "b_hh_f": u(ks[4], (4 * nhidden,)),
        "w_ih_b": u(ks[5], (4 * nhidden, embedding_dim)),
        "w_hh_b": u(ks[6], (4 * nhidden, nhidden)),
        "b_ih_b": u(ks[7], (4 * nhidden,)),
        "b_hh_b": u(ks[8], (4 * nhidden,)),
    }


def encoder_forward(params, x, nhidden, hidden=None, max_chunk=128):
    """Equivalent of Encoder.forward: x is int tokens of shape (seq_len, batch)."""
    T, B = x.shape
    H = nhidden
    E = params["embedding"].shape[1]
    Bp = max(8, ((B + 7) // 8) * 8)             # pad batch to f32 sublane width

    budget = _vmem_budget_bytes()
    TC = _pick_chunk(T, Bp, H, budget, max_chunk)
    NC = -(-T // TC)
    Tpad = NC * TC                               # pad T (never TC=1 for prime T)

    # ---- embedding gather (XLA) + batch/time padding ------------------------
    emb = jnp.take(params["embedding"], x, axis=0).astype(jnp.float32)  # (T, B, E)
    if Bp != B:
        emb = jnp.pad(emb, ((0, 0), (0, Bp - B), (0, 0)))
    emb_f = emb
    emb_b = jnp.flip(emb, axis=0)               # backward chain walks reversed time
    if Tpad != T:
        pad_t = ((0, Tpad - T), (0, 0), (0, 0))
        emb_f = jnp.pad(emb_f, pad_t)
        emb_b = jnp.pad(emb_b, pad_t)

    # ---- hoisted input projection: one big parallel GEMM per direction ------
    bf = params["b_ih_f"] + params["b_hh_f"]
    bb = params["b_ih_b"] + params["b_hh_b"]
    zx_f = emb_f.reshape(Tpad * Bp, E) @ params["w_ih_f"].T + bf        # (N, 4H)
    zx_b = emb_b.reshape(Tpad * Bp, E) @ params["w_ih_b"].T + bb        # (N, 4H)
    # gate-interleaved fused layout: [i_f,i_b,f_f,f_b,g_f,g_b,o_f,o_b]
    zx = jnp.stack([zx_f.reshape(-1, 4, H), zx_b.reshape(-1, 4, H)], axis=2)
    zx = zx.reshape(Tpad * Bp, 8 * H)

    # ---- fused block-diagonal recurrent weight (2H, 8H), same column layout --
    wf = params["w_hh_f"].T.reshape(H, 4, 1, H)
    wb = params["w_hh_b"].T.reshape(H, 4, 1, H)
    zw = jnp.zeros_like(wf)
    whh = jnp.concatenate(
        [jnp.concatenate([wf, zw], axis=2),
         jnp.concatenate([zw, wb], axis=2)], axis=0).reshape(2 * H, 8 * H)

    # ---- fused initial state [h_f | h_b] -------------------------------------
    if hidden is None:
        h0c = jnp.zeros((Bp, 2 * H), jnp.float32)
        c0c = jnp.zeros((Bp, 2 * H), jnp.float32)
    else:
        h0, c0 = hidden

        def fuse(s):
            s = jnp.asarray(s, jnp.float32)
            if Bp != B:
                s = jnp.pad(s, ((0, 0), (0, Bp - B), (0, 0)))
            return jnp.concatenate([s[0], s[1]], axis=1)

        h0c, c0c = fuse(h0), fuse(c0)

    out, hn, cn = _bilstm_recurrence(
        zx, h0c, c0c, whh,
        T_real=T, Tpad=Tpad, TC=TC, Bp=Bp, H=H, budget=budget)

    out3 = out.reshape(Tpad, Bp, 2 * H)
    y_f = out3[:T, :B, :H]
    y_b = jnp.flip(out3[:T, :B, H:], axis=0)    # un-reverse the backward direction
    y = y_f + y_b
    h_n = jnp.stack([hn[:B, :H], hn[:B, H:]], axis=0)
    c_n = jnp.stack([cn[:B, :H], cn[:B, H:]], axis=0)
    return y, (h_n, c_n)


# ----------------------------------------------------------------------------
# Pure-JAX reference (scan) for verification.
# ----------------------------------------------------------------------------
def _lstm_ref_dir(emb, h0, c0, w_ih, w_hh, b_ih, b_hh, reverse):
    H = w_hh.shape[1]

    def step(carry, x_t):
        h, c = carry
        z = x_t @ w_ih.T + h @ w_hh.T + b_ih + b_hh
        i = jax.nn.sigmoid(z[:, :H])
        f = jax.nn.sigmoid(z[:, H:2 * H])
        g = jnp.tanh(z[:, 2 * H:3 * H])
        o = jax.nn.sigmoid(z[:, 3 * H:])
        c = f * c + i * g
        h = o * jnp.tanh(c)
        return (h, c), h

    xs = emb[::-1] if reverse else emb
    (hT, cT), ys = lax.scan(step, (h0, c0), xs)
    if reverse:
        ys = ys[::-1]
    return ys, hT, cT


def encoder_ref(params, x, nhidden):
    emb = jnp.take(params["embedding"], x, axis=0).astype(jnp.float32)
    B = x.shape[1]
    z = jnp.zeros((B, nhidden), jnp.float32)
    yf, hf, cf = _lstm_ref_dir(emb, z, z, params["w_ih_f"], params["w_hh_f"],
                               params["b_ih_f"], params["b_hh_f"], reverse=False)
    yb, hb, cb = _lstm_ref_dir(emb, z, z, params["w_ih_b"], params["w_hh_b"],
                               params["b_ih_b"], params["b_hh_b"], reverse=True)
    return yf + yb, (jnp.stack([hf, hb]), jnp.stack([cf, cb]))


if __name__ == "__main__":
    vocab_size, embedding_dim, nhidden = 50, 16, 32
    seq_len, batch = 8, 2

    key = jax.random.PRNGKey(0)
    kp, kx = jax.random.split(key)
    params = init_params(kp, vocab_size, embedding_dim, nhidden)
    x = jax.random.randint(kx, (seq_len, batch), 0, vocab_size, dtype=jnp.int32)

    out, (h_n, c_n) = encoder_forward(params, x, nhidden)
    jax.block_until_ready((out, h_n, c_n))

    out_r, (h_r, c_r) = encoder_ref(params, x, nhidden)
    assert out.shape == (seq_len, batch, nhidden)
    assert h_n.shape == (2, batch, nhidden) and c_n.shape == (2, batch, nhidden)
    assert jnp.allclose(out, out_r, atol=1e-4), "output mismatch"
    assert jnp.allclose(h_n, h_r, atol=1e-4), "h_n mismatch"
    assert jnp.allclose(c_n, c_r, atol=1e-4), "c_n mismatch"

    # also exercise the multi-chunk + T-padding (masked-tail) path
    out2, (h2, c2) = encoder_forward(params, x, nhidden, max_chunk=3)
    jax.block_until_ready(out2)
    assert jnp.allclose(out2, out_r, atol=1e-4), "chunked output mismatch"
    assert jnp.allclose(h2, h_r, atol=1e-4), "chunked h_n mismatch"
    assert jnp.allclose(c2, c_r, atol=1e-4), "chunked c_n mismatch"

    print("KERNEL_OK")
</pallas_src>

<mosaic_0001>
module attributes {stable_mosaic.version = 11 : i64} {
  func.func @kernel(%arg0: i32, %arg1: memref<64x256xf32, #tpu.memory_space<vmem>>, %arg2: memref<8x64xf32, #tpu.memory_space<vmem>>, %arg3: memref<8x64xf32, #tpu.memory_space<vmem>>, %arg4: memref<64x256xf32, #tpu.memory_space<vmem>>, %arg5: memref<64x64xf32, #tpu.memory_space<vmem>>, %arg6: memref<8x64xf32, #tpu.memory_space<vmem>>, %arg7: memref<8x64xf32, #tpu.memory_space<vmem>>, %arg8: memref<8x64xf32, #tpu.memory_space<vmem>>, %arg9: memref<8x64xf32, #tpu.memory_space<vmem>>) attributes {dimension_semantics = [#tpu.dimension_semantics<arbitrary>], iteration_bounds = array<i64: 1>, scalar_prefetch = 0 : i64, scratch_operands = 2 : i64, tpu.core_type = #tpu.core_type<tc>, window_params = [{transform_indices = @transform_0, window_bounds = array<i64: 64, 256>}, {pipeline_mode = #tpu.pipeline_mode<synchronous>, transform_indices = @transform_1, window_bounds = array<i64: 8, 64>}, {pipeline_mode = #tpu.pipeline_mode<synchronous>, transform_indices = @transform_2, window_bounds = array<i64: 8, 64>}, {pipeline_mode = #tpu.pipeline_mode<synchronous>, transform_indices = @transform_3, window_bounds = array<i64: 64, 256>}, {transform_indices = @transform_4, window_bounds = array<i64: 64, 64>}, {pipeline_mode = #tpu.pipeline_mode<synchronous>, transform_indices = @transform_5, window_bounds = array<i64: 8, 64>}, {pipeline_mode = #tpu.pipeline_mode<synchronous>, transform_indices = @transform_6, window_bounds = array<i64: 8, 64>}]} {
    %c0_i32 = arith.constant 0 : i32
    %0 = arith.cmpi eq, %arg0, %c0_i32 : i32
    %1 = arith.extui %0 : i1 to i32
    %c0_i32_0 = arith.constant 0 : i32
    %2 = arith.cmpi ne, %1, %c0_i32_0 : i32
    scf.if %2 {
      %c0_60 = arith.constant 0 : index
      %c0_61 = arith.constant 0 : index
      %243 = vector.load %arg2[%c0_60, %c0_61] : memref<8x64xf32, #tpu.memory_space<vmem>>, vector<8x64xf32>
      %c0_62 = arith.constant 0 : index
      %c0_63 = arith.constant 0 : index
      %244 = vector.load %arg8[%c0_62, %c0_63] : memref<8x64xf32, #tpu.memory_space<vmem>>, vector<8x64xf32>
      tpu.vector_store %arg8[%c0_62, %c0_63], %243 {strides = array<i32>} : memref<8x64xf32, #tpu.memory_space<vmem>>, vector<8x64xf32>,
      %c0_64 = arith.constant 0 : index
      %c0_65 = arith.constant 0 : index
      %245 = vector.load %arg3[%c0_64, %c0_65] : memref<8x64xf32, #tpu.memory_space<vmem>>, vector<8x64xf32>
      %c0_66 = arith.constant 0 : index
      %c0_67 = arith.constant 0 : index
      %246 = vector.load %arg9[%c0_66, %c0_67] : memref<8x64xf32, #tpu.memory_space<vmem>>, vector<8x64xf32>
      tpu.vector_store %arg9[%c0_66, %c0_67], %245 {strides = array<i32>} : memref<8x64xf32, #tpu.memory_space<vmem>>, vector<8x64xf32>,
    } else {
    }
    %c0 = arith.constant 0 : index
    %c0_1 = arith.constant 0 : index
    %3 = vector.load %arg4[%c0, %c0_1] : memref<64x256xf32, #tpu.memory_space<vmem>>, vector<64x256xf32>
    %c0_2 = arith.constant 0 : index
    %c0_3 = arith.constant 0 : index
    %4 = vector.load %arg8[%c0_2, %c0_3] : memref<8x64xf32, #tpu.memory_space<vmem>>, vector<8x64xf32>
    %c0_4 = arith.constant 0 : index
    %c0_5 = arith.constant 0 : index
    %5 = vector.load %arg9[%c0_4, %c0_5] : memref<8x64xf32, #tpu.memory_space<vmem>>, vector<8x64xf32>
    %c0_i32_6 = arith.constant 0 : i32
    %c8_i32 = arith.constant 8 : i32
    %6 = arith.muli %c0_i32_6, %c8_i32 : i32
    %7 = tpu.assume_multiple %6, 8 : i32
    %8 = arith.index_cast %7 : i32 to index
    %c0_7 = arith.constant 0 : index
    %9 = vector.load %arg1[%8, %c0_7] : memref<64x256xf32, #tpu.memory_space<vmem>>, vector<8x256xf32>
    %cst = arith.constant dense<0.000000e+00> : vector<8x256xf32>
    %10 = tpu.matmul %4, %3, %cst {dimension_numbers = #tpu.dot_dimension_numbers<[1], [0], [0], [1], [0, 0, 1, 1], [], []>} : vector<8x64xf32>, vector<64x256xf32>, vector<8x256xf32> -> vector<8x256xf32>
    %11 = arith.addf %9, %10 : vector<8x256xf32>
    %12 = vector.extract_strided_slice %11 {offsets = [0, 0], sizes = [8, 128], strides = [1, 1]} : vector<8x256xf32> to vector<8x128xf32>
    %13 = arith.negf %12 : vector<8x128xf32>
    %14 = math.exp %13 : vector<8x128xf32>
    %cst_8 = arith.constant 1.000000e+00 : f32
    %15 = vector.broadcast %cst_8 : f32 to vector<8x128xf32>
    %16 = arith.addf %15, %14 : vector<8x128xf32>
    %17 = arith.divf %15, %16 : vector<8x128xf32>
    %18 = vector.extract_strided_slice %17 {offsets = [0, 0], sizes = [8, 64], strides = [1, 1]} : vector<8x128xf32> to vector<8x64xf32>
    %19 = vector.extract_strided_slice %17 {offsets = [0, 64], sizes = [8, 64], strides = [1, 1]} : vector<8x128xf32> to vector<8x64xf32>
    %20 = vector.extract_strided_slice %11 {offsets = [0, 128], sizes = [8, 64], strides = [1, 1]} : vector<8x256xf32> to vector<8x64xf32>
    %21 = math.tanh %20 : vector<8x64xf32>
    %22 = vector.extract_strided_slice %11 {offsets = [0, 192], sizes = [8, 64], strides = [1, 1]} : vector<8x256xf32> to vector<8x64xf32>
    %23 = arith.negf %22 : vector<8x64xf32>
    %24 = math.exp %23 : vector<8x64xf32>
    %cst_9 = arith.constant 1.000000e+00 : f32
    %25 = vector.broadcast %cst_9 : f32 to vector<8x64xf32>
    %26 = arith.addf %25, %24 : vector<8x64xf32>
    %27 = arith.divf %25, %26 : vector<8x64xf32>
    %28 = arith.mulf %19, %5 : vector<8x64xf32>
    %29 = arith.mulf %18, %21 : vector<8x64xf32>
    %30 = arith.addf %28, %29 : vector<8x64xf32>
    %31 = math.tanh %30 : vector<8x64xf32>
    %32 = arith.mulf %27, %31 : vector<8x64xf32>
    %33 = arith.index_cast %7 : i32 to index
    %c0_10 = arith.constant 0 : index
    %34 = vector.load %arg5[%33, %c0_10] : memref<64x64xf32, #tpu.memory_space<vmem>>, vector<8x64xf32>
    tpu.vector_store %arg5[%33, %c0_10], %32 {strides = array<i32>} : memref<64x64xf32, #tpu.memory_space<vmem>>, vector<8x64xf32>,
    %c1_i32 = arith.constant 1 : i32
    %c8_i32_11 = arith.constant 8 : i32
    %35 = arith.muli %c1_i32, %c8_i32_11 : i32
    %36 = tpu.assume_multiple %35, 8 : i32
    %37 = arith.index_cast %36 : i32 to index
    %c0_12 = arith.constant 0 : index
    %38 = vector.load %arg1[%37, %c0_12] : memref<64x256xf32, #tpu.memory_space<vmem>>, vector<8x256xf32>
    %cst_13 = arith.constant dense<0.000000e+00> : vector<8x256xf32>
    %39 = tpu.matmul %32, %3, %cst_13 {dimension_numbers = #tpu.dot_dimension_numbers<[1], [0], [0], [1], [0, 0, 1, 1], [], []>} : vector<8x64xf32>, vector<64x256xf32>, vector<8x256xf32> -> vector<8x256xf32>
    %40 = arith.addf %38, %39 : vector<8x256xf32>
    %41 = vector.extract_strided_slice %40 {offsets = [0, 0], sizes = [8, 128], strides = [1, 1]} : vector<8x256xf32> to vector<8x128xf32>
    %42 = arith.negf %41 : vector<8x128xf32>
    %43 = math.exp %42 : vector<8x128xf32>
    %cst_14 = arith.constant 1.000000e+00 : f32
    %44 = vector.broadcast %cst_14 : f32 to vector<8x128xf32>
    %45 = arith.addf %44, %43 : vector<8x128xf32>
    %46 = arith.divf %44, %45 : vector<8x128xf32>
    %47 = vector.extract_strided_slice %46 {offsets = [0, 0], sizes = [8, 64], strides = [1, 1]} : vector<8x128xf32> to vector<8x64xf32>
    %48 = vector.extract_strided_slice %46 {offsets = [0, 64], sizes = [8, 64], strides = [1, 1]} : vector<8x128xf32> to vector<8x64xf32>
    %49 = vector.extract_strided_slice %40 {offsets = [0, 128], sizes = [8, 64], strides = [1, 1]} : vector<8x256xf32> to vector<8x64xf32>
    %50 = math.tanh %49 : vector<8x64xf32>
    %51 = vector.extract_strided_slice %40 {offsets = [0, 192], sizes = [8, 64], strides = [1, 1]} : vector<8x256xf32> to vector<8x64xf32>
    %52 = arith.negf %51 : vector<8x64xf32>
    %53 = math.exp %52 : vector<8x64xf32>
    %cst_15 = arith.constant 1.000000e+00 : f32
    %54 = vector.broadcast %cst_15 : f32 to vector<8x64xf32>
    %55 = arith.addf %54, %53 : vector<8x64xf32>
    %56 = arith.divf %54, %55 : vector<8x64xf32>
    %57 = arith.mulf %48, %30 : vector<8x64xf32>
    %58 = arith.mulf %47, %50 : vector<8x64xf32>
    %59 = arith.addf %57, %58 : vector<8x64xf32>
    %60 = math.tanh %59 : vector<8x64xf32>
    %61 = arith.mulf %56, %60 : vector<8x64xf32>
    %62 = arith.index_cast %36 : i32 to index
    %c0_16 = arith.constant 0 : index
    %63 = vector.load %arg5[%62, %c0_16] : memref<64x64xf32, #tpu.memory_space<vmem>>, vector<8x64xf32>
    tpu.vector_store %arg5[%62, %c0_16], %61 {strides = array<i32>} : memref<64x64xf32, #tpu.memory_space<vmem>>, vector<8x64xf32>,
    %c2_i32 = arith.constant 2 : i32
    %c8_i32_17 = arith.constant 8 : i32
    %64 = arith.muli %c2_i32, %c8_i32_17 : i32
    %65 = tpu.assume_multiple %64, 8 : i32
    %66 = arith.index_cast %65 : i32 to index
    %c0_18 = arith.constant 0 : index
    %67 = vector.load %arg1[%66, %c0_18] : memref<64x256xf32, #tpu.memory_space<vmem>>, vector<8x256xf32>
    %cst_19 = arith.constant dense<0.000000e+00> : vector<8x256xf32>
    %68 = tpu.matmul %61, %3, %cst_19 {dimension_numbers = #tpu.dot_dimension_numbers<[1], [0], [0], [1], [0, 0, 1, 1], [], []>} : vector<8x64xf32>, vector<64x256xf32>, vector<8x256xf32> -> vector<8x256xf32>
    %69 = arith.addf %67, %68 : vector<8x256xf32>
    %70 = vector.extract_strided_slice %69 {offsets = [0, 0], sizes = [8, 128], strides = [1, 1]} : vector<8x256xf32> to vector<8x128xf32>
    %71 = arith.negf %70 : vector<8x128xf32>
    %72 = math.exp %71 : vector<8x128xf32>
    %cst_20 = arith.constant 1.000000e+00 : f32
    %73 = vector.broadcast %cst_20 : f32 to vector<8x128xf32>
    %74 = arith.addf %73, %72 : vector<8x128xf32>
    %75 = arith.divf %73, %74 : vector<8x128xf32>
    %76 = vector.extract_strided_slice %75 {offsets = [0, 0], sizes = [8, 64], strides = [1, 1]} : vector<8x128xf32> to vector<8x64xf32>
    %77 = vector.extract_strided_slice %75 {offsets = [0, 64], sizes = [8, 64], strides = [1, 1]} : vector<8x128xf32> to vector<8x64xf32>
    %78 = vector.extract_strided_slice %69 {offsets = [0, 128], sizes = [8, 64], strides = [1, 1]} : vector<8x256xf32> to vector<8x64xf32>
    %79 = math.tanh %78 : vector<8x64xf32>
    %80 = vector.extract_strided_slice %69 {offsets = [0, 192], sizes = [8, 64], strides = [1, 1]} : vector<8x256xf32> to vector<8x64xf32>
    %81 = arith.negf %80 : vector<8x64xf32>
    %82 = math.exp %81 : vector<8x64xf32>
    %cst_21 = arith.constant 1.000000e+00 : f32
    %83 = vector.broadcast %cst_21 : f32 to vector<8x64xf32>
    %84 = arith.addf %83, %82 : vector<8x64xf32>
    %85 = arith.divf %83, %84 : vector<8x64xf32>
    %86 = arith.mulf %77, %59 : vector<8x64xf32>
    %87 = arith.mulf %76, %79 : vector<8x64xf32>
    %88 = arith.addf %86, %87 : vector<8x64xf32>
    %89 = math.tanh %88 : vector<8x64xf32>
    %90 = arith.mulf %85, %89 : vector<8x64xf32>
    %91 = arith.index_cast %65 : i32 to index
    %c0_22 = arith.constant 0 : index
    %92 = vector.load %arg5[%91, %c0_22] : memref<64x64xf32, #tpu.memory_space<vmem>>, vector<8x64xf32>
    tpu.vector_store %arg5[%91, %c0_22], %90 {strides = array<i32>} : memref<64x64xf32, #tpu.memory_space<vmem>>, vector<8x64xf32>,
    %c3_i32 = arith.constant 3 : i32
    %c8_i32_23 = arith.constant 8 : i32
    %93 = arith.muli %c3_i32, %c8_i32_23 : i32
    %94 = tpu.assume_multiple %93, 8 : i32
    %95 = arith.index_cast %94 : i32 to index
    %c0_24 = arith.constant 0 : index
    %96 = vector.load %arg1[%95, %c0_24] : memref<64x256xf32, #tpu.memory_space<vmem>>, vector<8x256xf32>
    %cst_25 = arith.constant dense<0.000000e+00> : vector<8x256xf32>
    %97 = tpu.matmul %90, %3, %cst_25 {dimension_numbers = #tpu.dot_dimension_numbers<[1], [0], [0], [1], [0, 0, 1, 1], [], []>} : vector<8x64xf32>, vector<64x256xf32>, vector<8x256xf32> -> vector<8x256xf32>
    %98 = arith.addf %96, %97 : vector<8x256xf32>
    %99 = vector.extract_strided_slice %98 {offsets = [0, 0], sizes = [8, 128], strides = [1, 1]} : vector<8x256xf32> to vector<8x128xf32>
    %100 = arith.negf %99 : vector<8x128xf32>
    %101 = math.exp %100 : vector<8x128xf32>
    %cst_26 = arith.constant 1.000000e+00 : f32
    %102 = vector.broadcast %cst_26 : f32 to vector<8x128xf32>
    %103 = arith.addf %102, %101 : vector<8x128xf32>
    %104 = arith.divf %102, %103 : vector<8x128xf32>
    %105 = vector.extract_strided_slice %104 {offsets = [0, 0], sizes = [8, 64], strides = [1, 1]} : vector<8x128xf32> to vector<8x64xf32>
    %106 = vector.extract_strided_slice %104 {offsets = [0, 64], sizes = [8, 64], strides = [1, 1]} : vector<8x128xf32> to vector<8x64xf32>
    %107 = vector.extract_strided_slice %98 {offsets = [0, 128], sizes = [8, 64], strides = [1, 1]} : vector<8x256xf32> to vector<8x64xf32>
    %108 = math.tanh %107 : vector<8x64xf32>
    %109 = vector.extract_strided_slice %98 {offsets = [0, 192], sizes = [8, 64], strides = [1, 1]} : vector<8x256xf32> to vector<8x64xf32>
    %110 = arith.negf %109 : vector<8x64xf32>
    %111 = math.exp %110 : vector<8x64xf32>
    %cst_27 = arith.constant 1.000000e+00 : f32
    %112 = vector.broadcast %cst_27 : f32 to vector<8x64xf32>
    %113 = arith.addf %112, %111 : vector<8x64xf32>
    %114 = arith.divf %112, %113 : vector<8x64xf32>
    %115 = arith.mulf %106, %88 : vector<8x64xf32>
    %116 = arith.mulf %105, %108 : vector<8x64xf32>
    %117 = arith.addf %115, %116 : vector<8x64xf32>
    %118 = math.tanh %117 : vector<8x64xf32>
    %119 = arith.mulf %114, %118 : vector<8x64xf32>
    %120 = arith.index_cast %94 : i32 to index
    %c0_28 = arith.constant 0 : index
    %121 = vector.load %arg5[%120, %c0_28] : memref<64x64xf32, #tpu.memory_space<vmem>>, vector<8x64xf32>
    tpu.vector_store %arg5[%120, %c0_28], %119 {strides = array<i32>} : memref<64x64xf32, #tpu.memory_space<vmem>>, vector<8x64xf32>,
    %c4_i32 = arith.constant 4 : i32
    %c8_i32_29 = arith.constant 8 : i32
    %122 = arith.muli %c4_i32, %c8_i32_29 : i32
    %123 = tpu.assume_multiple %122, 8 : i32
    %124 = arith.index_cast %123 : i32 to index
    %c0_30 = arith.constant 0 : index
    %125 = vector.load %arg1[%124, %c0_30] : memref<64x256xf32, #tpu.memory_space<vmem>>, vector<8x256xf32>
    %cst_31 = arith.constant dense<0.000000e+00> : vector<8x256xf32>
    %126 = tpu.matmul %119, %3, %cst_31 {dimension_numbers = #tpu.dot_dimension_numbers<[1], [0], [0], [1], [0, 0, 1, 1], [], []>} : vector<8x64xf32>, vector<64x256xf32>, vector<8x256xf32> -> vector<8x256xf32>
    %127 = arith.addf %125, %126 : vector<8x256xf32>
    %128 = vector.extract_strided_slice %127 {offsets = [0, 0], sizes = [8, 128], strides = [1, 1]} : vector<8x256xf32> to vector<8x128xf32>
    %129 = arith.negf %128 : vector<8x128xf32>
    %130 = math.exp %129 : vector<8x128xf32>
    %cst_32 = arith.constant 1.000000e+00 : f32
    %131 = vector.broadcast %cst_32 : f32 to vector<8x128xf32>
    %132 = arith.addf %131, %130 : vector<8x128xf32>
    %133 = arith.divf %131, %132 : vector<8x128xf32>
    %134 = vector.extract_strided_slice %133 {offsets = [0, 0], sizes = [8, 64], strides = [1, 1]} : vector<8x128xf32> to vector<8x64xf32>
    %135 = vector.extract_strided_slice %133 {offsets = [0, 64], sizes = [8, 64], strides = [1, 1]} : vector<8x128xf32> to vector<8x64xf32>
    %136 = vector.extract_strided_slice %127 {offsets = [0, 128], sizes = [8, 64], strides = [1, 1]} : vector<8x256xf32> to vector<8x64xf32>
    %137 = math.tanh %136 : vector<8x64xf32>
    %138 = vector.extract_strided_slice %127 {offsets = [0, 192], sizes = [8, 64], strides = [1, 1]} : vector<8x256xf32> to vector<8x64xf32>
    %139 = arith.negf %138 : vector<8x64xf32>
    %140 = math.exp %139 : vector<8x64xf32>
    %cst_33 = arith.constant 1.000000e+00 : f32
    %141 = vector.broadcast %cst_33 : f32 to vector<8x64xf32>
    %142 = arith.addf %141, %140 : vector<8x64xf32>
    %143 = arith.divf %141, %142 : vector<8x64xf32>
    %144 = arith.mulf %135, %117 : vector<8x64xf32>
    %145 = arith.mulf %134, %137 : vector<8x64xf32>
    %146 = arith.addf %144, %145 : vector<8x64xf32>
    %147 = math.tanh %146 : vector<8x64xf32>
    %148 = arith.mulf %143, %147 : vector<8x64xf32>
    %149 = arith.index_cast %123 : i32 to index
    %c0_34 = arith.constant 0 : index
    %150 = vector.load %arg5[%149, %c0_34] : memref<64x64xf32, #tpu.memory_space<vmem>>, vector<8x64xf32>
    tpu.vector_store %arg5[%149, %c0_34], %148 {strides = array<i32>} : memref<64x64xf32, #tpu.memory_space<vmem>>, vector<8x64xf32>,
    %c5_i32 = arith.constant 5 : i32
    %c8_i32_35 = arith.constant 8 : i32
    %151 = arith.muli %c5_i32, %c8_i32_35 : i32
    %152 = tpu.assume_multiple %151, 8 : i32
    %153 = arith.index_cast %152 : i32 to index
    %c0_36 = arith.constant 0 : index
    %154 = vector.load %arg1[%153, %c0_36] : memref<64x256xf32, #tpu.memory_space<vmem>>, vector<8x256xf32>
    %cst_37 = arith.constant dense<0.000000e+00> : vector<8x256xf32>
    %155 = tpu.matmul %148, %3, %cst_37 {dimension_numbers = #tpu.dot_dimension_numbers<[1], [0], [0], [1], [0, 0, 1, 1], [], []>} : vector<8x64xf32>, vector<64x256xf32>, vector<8x256xf32> -> vector<8x256xf32>
    %156 = arith.addf %154, %155 : vector<8x256xf32>
    %157 = vector.extract_strided_slice %156 {offsets = [0, 0], sizes = [8, 128], strides = [1, 1]} : vector<8x256xf32> to vector<8x128xf32>
    %158 = arith.negf %157 : vector<8x128xf32>
    %159 = math.exp %158 : vector<8x128xf32>
    %cst_38 = arith.constant 1.000000e+00 : f32
    %160 = vector.broadcast %cst_38 : f32 to vector<8x128xf32>
    %161 = arith.addf %160, %159 : vector<8x128xf32>
    %162 = arith.divf %160, %161 : vector<8x128xf32>
    %163 = vector.extract_strided_slice %162 {offsets = [0, 0], sizes = [8, 64], strides = [1, 1]} : vector<8x128xf32> to vector<8x64xf32>
    %164 = vector.extract_strided_slice %162 {offsets = [0, 64], sizes = [8, 64], strides = [1, 1]} : vector<8x128xf32> to vector<8x64xf32>
    %165 = vector.extract_strided_slice %156 {offsets = [0, 128], sizes = [8, 64], strides = [1, 1]} : vector<8x256xf32> to vector<8x64xf32>
    %166 = math.tanh %165 : vector<8x64xf32>
    %167 = vector.extract_strided_slice %156 {offsets = [0, 192], sizes = [8, 64], strides = [1, 1]} : vector<8x256xf32> to vector<8x64xf32>
    %168 = arith.negf %167 : vector<8x64xf32>
    %169 = math.exp %168 : vector<8x64xf32>
    %cst_39 = arith.constant 1.000000e+00 : f32
    %170 = vector.broadcast %cst_39 : f32 to vector<8x64xf32>
    %171 = arith.addf %170, %169 : vector<8x64xf32>
    %172 = arith.divf %170, %171 : vector<8x64xf32>
    %173 = arith.mulf %164, %146 : vector<8x64xf32>
    %174 = arith.mulf %163, %166 : vector<8x64xf32>
    %175 = arith.addf %173, %174 : vector<8x64xf32>
    %176 = math.tanh %175 : vector<8x64xf32>
    %177 = arith.mulf %172, %176 : vector<8x64xf32>
    %178 = arith.index_cast %152 : i32 to index
    %c0_40 = arith.constant 0 : index
    %179 = vector.load %arg5[%178, %c0_40] : memref<64x64xf32, #tpu.memory_space<vmem>>, vector<8x64xf32>
    tpu.vector_store %arg5[%178, %c0_40], %177 {strides = array<i32>} : memref<64x64xf32, #tpu.memory_space<vmem>>, vector<8x64xf32>,
    %c6_i32 = arith.constant 6 : i32
    %c8_i32_41 = arith.constant 8 : i32
    %180 = arith.muli %c6_i32, %c8_i32_41 : i32
    %181 = tpu.assume_multiple %180, 8 : i32
    %182 = arith.index_cast %181 : i32 to index
    %c0_42 = arith.constant 0 : index
    %183 = vector.load %arg1[%182, %c0_42] : memref<64x256xf32, #tpu.memory_space<vmem>>, vector<8x256xf32>
    %cst_43 = arith.constant dense<0.000000e+00> : vector<8x256xf32>
    %184 = tpu.matmul %177, %3, %cst_43 {dimension_numbers = #tpu.dot_dimension_numbers<[1], [0], [0], [1], [0, 0, 1, 1], [], []>} : vector<8x64xf32>, vector<64x256xf32>, vector<8x256xf32> -> vector<8x256xf32>
    %185 = arith.addf %183, %184 : vector<8x256xf32>
    %186 = vector.extract_strided_slice %185 {offsets = [0, 0], sizes = [8, 128], strides = [1, 1]} : vector<8x256xf32> to vector<8x128xf32>
    %187 = arith.negf %186 : vector<8x128xf32>
    %188 = math.exp %187 : vector<8x128xf32>
    %cst_44 = arith.constant 1.000000e+00 : f32
    %189 = vector.broadcast %cst_44 : f32 to vector<8x128xf32>
    %190 = arith.addf %189, %188 : vector<8x128xf32>
    %191 = arith.divf %189, %190 : vector<8x128xf32>
    %192 = vector.extract_strided_slice %191 {offsets = [0, 0], sizes = [8, 64], strides = [1, 1]} : vector<8x128xf32> to vector<8x64xf32>
    %193 = vector.extract_strided_slice %191 {offsets = [0, 64], sizes = [8, 64], strides = [1, 1]} : vector<8x128xf32> to vector<8x64xf32>
    %194 = vector.extract_strided_slice %185 {offsets = [0, 128], sizes = [8, 64], strides = [1, 1]} : vector<8x256xf32> to vector<8x64xf32>
    %195 = math.tanh %194 : vector<8x64xf32>
    %196 = vector.extract_strided_slice %185 {offsets = [0, 192], sizes = [8, 64], strides = [1, 1]} : vector<8x256xf32> to vector<8x64xf32>
    %197 = arith.negf %196 : vector<8x64xf32>
    %198 = math.exp %197 : vector<8x64xf32>
    %cst_45 = arith.constant 1.000000e+00 : f32
    %199 = vector.broadcast %cst_45 : f32 to vector<8x64xf32>
    %200 = arith.addf %199, %198 : vector<8x64xf32>
    %201 = arith.divf %199, %200 : vector<8x64xf32>
    %202 = arith.mulf %193, %175 : vector<8x64xf32>
    %203 = arith.mulf %192, %195 : vector<8x64xf32>
    %204 = arith.addf %202, %203 : vector<8x64xf32>
    %205 = math.tanh %204 : vector<8x64xf32>
    %206 = arith.mulf %201, %205 : vector<8x64xf32>
    %207 = arith.index_cast %181 : i32 to index
    %c0_46 = arith.constant 0 : index
    %208 = vector.load %arg5[%207, %c0_46] : memref<64x64xf32, #tpu.memory_space<vmem>>, vector<8x64xf32>
    tpu.vector_store %arg5[%207, %c0_46], %206 {strides = array<i32>} : memref<64x64xf32, #tpu.memory_space<vmem>>, vector<8x64xf32>,
    %c7_i32 = arith.constant 7 : i32
    %c8_i32_47 = arith.constant 8 : i32
    %209 = arith.muli %c7_i32, %c8_i32_47 : i32
    %210 = tpu.assume_multiple %209, 8 : i32
    %211 = arith.index_cast %210 : i32 to index
    %c0_48 = arith.constant 0 : index
    %212 = vector.load %arg1[%211, %c0_48] : memref<64x256xf32, #tpu.memory_space<vmem>>, vector<8x256xf32>
    %cst_49 = arith.constant dense<0.000000e+00> : vector<8x256xf32>
    %213 = tpu.matmul %206, %3, %cst_49 {dimension_numbers = #tpu.dot_dimension_numbers<[1], [0], [0], [1], [0, 0, 1, 1], [], []>} : vector<8x64xf32>, vector<64x256xf32>, vector<8x256xf32> -> vector<8x256xf32>
    %214 = arith.addf %212, %213 : vector<8x256xf32>
    %215 = vector.extract_strided_slice %214 {offsets = [0, 0], sizes = [8, 128], strides = [1, 1]} : vector<8x256xf32> to vector<8x128xf32>
    %216 = arith.negf %215 : vector<8x128xf32>
    %217 = math.exp %216 : vector<8x128xf32>
    %cst_50 = arith.constant 1.000000e+00 : f32
    %218 = vector.broadcast %cst_50 : f32 to vector<8x128xf32>
    %219 = arith.addf %218, %217 : vector<8x128xf32>
    %220 = arith.divf %218, %219 : vector<8x128xf32>
    %221 = vector.extract_strided_slice %220 {offsets = [0, 0], sizes = [8, 64], strides = [1, 1]} : vector<8x128xf32> to vector<8x64xf32>
    %222 = vector.extract_strided_slice %220 {offsets = [0, 64], sizes = [8, 64], strides = [1, 1]} : vector<8x128xf32> to vector<8x64xf32>
    %223 = vector.extract_strided_slice %214 {offsets = [0, 128], sizes = [8, 64], strides = [1, 1]} : vector<8x256xf32> to vector<8x64xf32>
    %224 = math.tanh %223 : vector<8x64xf32>
    %225 = vector.extract_strided_slice %214 {offsets = [0, 192], sizes = [8, 64], strides = [1, 1]} : vector<8x256xf32> to vector<8x64xf32>
    %226 = arith.negf %225 : vector<8x64xf32>
    %227 = math.exp %226 : vector<8x64xf32>
    %cst_51 = arith.constant 1.000000e+00 : f32
    %228 = vector.broadcast %cst_51 : f32 to vector<8x64xf32>
    %229 = arith.addf %228, %227 : vector<8x64xf32>
    %230 = arith.divf %228, %229 : vector<8x64xf32>
    %231 = arith.mulf %222, %204 : vector<8x64xf32>
    %232 = arith.mulf %221, %224 : vector<8x64xf32>
    %233 = arith.addf %231, %232 : vector<8x64xf32>
    %234 = math.tanh %233 : vector<8x64xf32>
    %235 = arith.mulf %230, %234 : vector<8x64xf32>
    %236 = arith.index_cast %210 : i32 to index
    %c0_52 = arith.constant 0 : index
    %237 = vector.load %arg5[%236, %c0_52] : memref<64x64xf32, #tpu.memory_space<vmem>>, vector<8x64xf32>
    tpu.vector_store %arg5[%236, %c0_52], %235 {strides = array<i32>} : memref<64x64xf32, #tpu.memory_space<vmem>>, vector<8x64xf32>,
    %c8_i32_53 = arith.constant 8 : i32
    %c0_54 = arith.constant 0 : index
    %c0_55 = arith.constant 0 : index
    %238 = vector.load %arg8[%c0_54, %c0_55] : memref<8x64xf32, #tpu.memory_space<vmem>>, vector<8x64xf32>
    tpu.vector_store %arg8[%c0_54, %c0_55], %235 {strides = array<i32>} : memref<8x64xf32, #tpu.memory_space<vmem>>, vector<8x64xf32>,
    %c0_56 = arith.constant 0 : index
    %c0_57 = arith.constant 0 : index
    %239 = vector.load %arg9[%c0_56, %c0_57] : memref<8x64xf32, #tpu.memory_space<vmem>>, vector<8x64xf32>
    tpu.vector_store %arg9[%c0_56, %c0_57], %233 {strides = array<i32>} : memref<8x64xf32, #tpu.memory_space<vmem>>, vector<8x64xf32>,
    %c0_i32_58 = arith.constant 0 : i32
    %240 = arith.cmpi eq, %arg0, %c0_i32_58 : i32
    %241 = arith.extui %240 : i1 to i32
    %c0_i32_59 = arith.constant 0 : i32
    %242 = arith.cmpi ne, %241, %c0_i32_59 : i32
    scf.if %242 {
      %c0_60 = arith.constant 0 : index
      %c0_61 = arith.constant 0 : index
      %243 = vector.load %arg6[%c0_60, %c0_61] : memref<8x64xf32, #tpu.memory_space<vmem>>, vector<8x64xf32>
      tpu.vector_store %arg6[%c0_60, %c0_61], %235 {strides = array<i32>} : memref<8x64xf32, #tpu.memory_space<vmem>>, vector<8x64xf32>,
      %c0_62 = arith.constant 0 : index
      %c0_63 = arith.constant 0 : index
      %244 = vector.load %arg7[%c0_62, %c0_63] : memref<8x64xf32, #tpu.memory_space<vmem>>, vector<8x64xf32>
      tpu.vector_store %arg7[%c0_62, %c0_63], %233 {strides = array<i32>} : memref<8x64xf32, #tpu.memory_space<vmem>>, vector<8x64xf32>,
    } else {
    }
    return
  }
  func.func @transform_0(%arg0: i32) -> (i32, i32) {
    %c0_i32 = arith.constant 0 : i32
    %c0_i32_0 = arith.constant 0 : i32
    return %arg0, %c0_i32 : i32, i32
  }
  func.func @transform_1(%arg0: i32) -> (i32, i32) {
    %c0_i32 = arith.constant 0 : i32
    %c0_i32_0 = arith.constant 0 : i32
    %c0_i32_1 = arith.constant 0 : i32
    return %c0_i32, %c0_i32_0 : i32, i32
  }
  func.func @transform_2(%arg0: i32) -> (i32, i32) {
    %c0_i32 = arith.constant 0 : i32
    %c0_i32_0 = arith.constant 0 : i32
    %c0_i32_1 = arith.constant 0 : i32
    return %c0_i32, %c0_i32_0 : i32, i32
  }
  func.func @transform_3(%arg0: i32) -> (i32, i32) {
    %c0_i32 = arith.constant 0 : i32
    %c0_i32_0 = arith.constant 0 : i32
    %c0_i32_1 = arith.constant 0 : i32
    return %c0_i32, %c0_i32_0 : i32, i32
  }
  func.func @transform_4(%arg0: i32) -> (i32, i32) {
    %c0_i32 = arith.constant 0 : i32
    %c0_i32_0 = arith.constant 0 : i32
    return %arg0, %c0_i32 : i32, i32
  }
  func.func @transform_5(%arg0: i32) -> (i32, i32) {
    %c0_i32 = arith.constant 0 : i32
    %c0_i32_0 = arith.constant 0 : i32
    %c0_i32_1 = arith.constant 0 : i32
    return %c0_i32, %c0_i32_0 : i32, i32
  }
  func.func @transform_6(%arg0: i32) -> (i32, i32) {
    %c0_i32 = arith.constant 0 : i32
    %c0_i32_0 = arith.constant 0 : i32
    %c0_i32_1 = arith.constant 0 : i32
    return %c0_i32, %c0_i32_0 : i32, i32
  }
}

</mosaic_0001>

<bundles_post_ra>
// kernel: tpu_custom_call.1
= control target key start
LH: loop header
LB: loop body
LE: loop exit
PB: predicated region body
PF: predicated region fallthrough
CT: control target
= control target key end

     0   :  { %12 = vsyncpa [#allocation5], 0  ;;  %s1593_s0 = inlined_call_operand.hbm [shape: f32[64,256], index: 0, kind: input, shape index: {}]   ;;  %s1594_s1 = inlined_call_operand.hbm [shape: f32[8,64], index: 1, kind: input, shape index: {}]   ;;  %s1595_s2 = inlined_call_operand.hbm [shape: f32[8,64], index: 2, kind: input, shape index: {}]   ;;  %s1596_s3 = inlined_call_operand.hbm [shape: f32[64,256], index: 3, kind: input, shape index: {}]   ;;  %s1597_s4 = inlined_call_operand.hbm [shape: f32[64,64], index: 4, kind: output, shape index: {0}]   ;;  %s1598_s5 = inlined_call_operand.hbm [shape: f32[8,64], index: 5, kind: output, shape index: {1}]   ;;  %s1599_s6 = inlined_call_operand.hbm [shape: f32[8,64], index: 6, kind: output, shape index: {2}]  }
   0x1   :  { %13 = vsyncpa [#allocation8], 0 }
   0x2   :  { %14 = vsyncpa [#allocation11], 0 }
   0x3   :  { %15 = vsyncpa [#allocation6], 0 }
   0x4   :  { %16 = vsyncpa [#allocation14], 0  ;;  %s1316_s21 = smov [#allocation7]   ;;  %s1317_s23 = smov [#allocation4]  }
   0x5   :  { %s35_s22 = sshll.u32 %s1316_s21, 4  ;;  %s22_s24 = sshll.u32 %s1317_s23, 4  ;;  %s36_s22 = int_to_ptr.vmem [resolvable:$true] %s35_s22  ;;  %s23_s24 = int_to_ptr.vmem [resolvable:$true] %s22_s24 }
   0x6   :  { %s1174_s25 = scalar_lea.vmem %s36_s22, 128  ;;  %p1179_p1 = scmp.lt.s32.totalorder %s36_s22, %s36_s22 }
   0x7   :  { %p1175_p0 = scmp.ne.s32.totalorder %s36_s22, %s1174_s25  ;;  %p1180_p2 = scmp.lt.s32.totalorder %s1174_s25, %s1174_s25 }
   0x9   :  { %p1181_p3 = por %p1180_p2, %p1179_p1 }
   0xb   :  { %p1182_p4 = pnand %p1181_p3, %p1175_p0 }
   0xd   :  { %1185 = shalt.err (!%p1182_p4)
}
   0xe   :  { %38 = dma.hbm_to_vmem [thread:$0]  %s1594_s1, 128, %s36_s22, [#allocation8]  }
   0xf   :  { %s1194_s28 = scalar_lea.vmem %s23_s24, 2048  ;;  %p1199_p6 = scmp.lt.s32.totalorder %s23_s24, %s23_s24 }
  0x10   :  { %p1195_p5 = scmp.ne.s32.totalorder %s23_s24, %s1194_s28  ;;  %p1200_p7 = scmp.lt.s32.totalorder %s1194_s28, %s1194_s28 }
  0x12   :  { %p1201_p8 = por %p1200_p7, %p1199_p6 }
  0x14   :  { %p1202_p9 = pnand %p1201_p8, %p1195_p5 }
  0x16   :  { %1205 = shalt.err (!%p1202_p9)
}
  0x17   :  { %s1318_s29 = smov 256   ;;  %s1319_s30 = smov 16  }
  0x18   :  { %28 = dma.hbm_to_vmem [thread:$0]  %s1593_s0, 2048, %s23_s24, [#allocation5], %s1318_s29, %s1318_s29, %s1319_s30  }
  0x19   :  { %s1320_s9 = smov [#allocation9]   ;;  %s1321_s11 = smov [#allocation10]  }
  0x1a   :  { %s45_s10 = sshll.u32 %s1320_s9, 4  ;;  %s54_s12 = sshll.u32 %s1321_s11, 4  ;;  %s46_s10 = int_to_ptr.vmem [resolvable:$true] %s45_s10  ;;  %s55_s12 = int_to_ptr.vmem [resolvable:$true] %s54_s12 }
  0x1b   :  { %s1214_s1 = scalar_lea.vmem %s46_s10, 128  ;;  %p1219_p11 = scmp.lt.s32.totalorder %s46_s10, %s46_s10 }
  0x1c   :  { %p1215_p10 = scmp.ne.s32.totalorder %s46_s10, %s1214_s1  ;;  %p1220_p12 = scmp.lt.s32.totalorder %s1214_s1, %s1214_s1 }
  0x1e   :  { %p1221_p13 = por %p1220_p12, %p1219_p11 }
  0x20   :  { %p1222_p0 = pnand %p1221_p13, %p1215_p10 }
  0x22   :  { %1225 = shalt.err (!%p1222_p0)
}
  0x23   :  { %48 = dma.hbm_to_vmem [thread:$0]  %s1595_s2, 128, %s46_s10, [#allocation8]  }
  0x24   :  { %s1234_s15 = scalar_lea.vmem %s55_s12, 2048  ;;  %p1239_p2 = scmp.lt.s32.totalorder %s55_s12, %s55_s12 }
  0x25   :  { %p1235_p1 = scmp.ne.s32.totalorder %s55_s12, %s1234_s15  ;;  %p1240_p3 = scmp.lt.s32.totalorder %s1234_s15, %s1234_s15 }
  0x27   :  { %p1241_p4 = por %p1240_p3, %p1239_p2 }
  0x29   :  { %p1242_p5 = pnand %p1241_p4, %p1235_p1 }
  0x2b   :  { %1245 = shalt.err (!%p1242_p5)
}
  0x2c   :  { %60 = dma.hbm_to_vmem [thread:$0]  %s1596_s3, 2048, %s55_s12, [#allocation11], %s1318_s29, %s1318_s29, %s1319_s30  }
  0x2d   :  { %1306 = dma.done.wait [#allocation5], 2048  }
  0x2e   :  { %1307 = vsyncadd [#allocation5], 4294965248 }
  0x2f   :  { %1308 = dma.done.wait [#allocation8], 256  }
  0x30   :  { %1309 = vsyncadd [#allocation8], 4294967040 }
  0x31   :  { %1310 = dma.done.wait [#allocation11], 2048  }
  0x32   :  { %1311 = vsyncadd [#allocation11], 4294965248  ;;  %v1322_v0 = vmov 0.0   ;;  %v1378_v1 = vld [vmem:[#allocation10 + $0x78] sm:$0xff]  ;;  %v1380_v2 = vld [vmem:[#allocation10 + $0x70] sm:$0xff]  ;;  %vm78_vm0 = vcmask 523264  }
  0x33   :  { %173 = vmatprep.mubr.f32.mxu0 %v1322_v0  ;;  %284 = vmatprep.mubr.f32.mxu1 %v1322_v0  ;;  %v1382_v3 = vld [vmem:[#allocation10 + $0x68] sm:$0xff]  ;;  %v1385_v4 = vld [vmem:[#allocation10 + $0x60] sm:$0xff]  ;;  %v1389_v5 = vld [vmem:[#allocation10 + $0x58] sm:$0xff]  ;;  %s1323_s2 = smov 64   ;;  %s1324_s3 = smov [#allocation13]  }
  0x34   :  { %125 = vmatprep.subr.mxu0 %v1378_v1  ;;  %236 = vmatprep.subr.mxu1 %v1378_v1  ;;  %v1393_v6 = vld [vmem:[#allocation10 + $0x50] sm:$0xff]  ;;  %v1397_v7 = vld [vmem:[#allocation10 + $0x48] sm:$0xff]  ;;  %v1401_v8 = vld [vmem:[#allocation10 + $0x40] sm:$0xff]  ;;  %s998_s17 = sshll.u32 %s1324_s3, 4  ;;  %s1325_s18 = smov [#allocation12]   ;;  %s999_s17 = int_to_ptr.vmem [resolvable:$true] %s998_s17 }
  0x35   :  { %126 = vmatpush1.msra.mxu0 %v1380_v2  ;;  %237 = vmatpush1.msra.mxu1 %v1380_v2  ;;  %v77_v9 = vld [vmem:[#allocation7] sm:$0xff]  ;;  %v80_v10 = vld [vmem:[#allocation9] sm:$0xff]  ;;  %v1415_v13 = vld [vmem:[#allocation10 + $0x28] sm:$0xff]  ;;  %s985_s19 = sshll.u32 %s1325_s18, 4  ;;  %s1326_s20 = smov [#allocation15]   ;;  %s986_s19 = int_to_ptr.vmem [resolvable:$true] %s985_s19 }
  0x36   :  { %127 = vmatprep.subr.mxu0 %v1382_v3  ;;  %238 = vmatprep.subr.mxu1 %v1382_v3  ;;  %v1405_v11 = vld [vmem:[#allocation10 + $0x38] sm:$0xff]  ;;  %79 = vst.msk [vmem:[#allocation2] sm:$0xff] %vm78_vm0, %v77_v9  ;;  %81 = vst.msk [vmem:[#allocation3] sm:$0xff] %vm78_vm0, %v80_v10  ;;  %v1411_v12 = vld [vmem:[#allocation10 + $0x30] sm:$0xff]  ;;  %s1008_s21 = sshll.u32 %s1326_s20, 4  ;;  %s1246_s22 = scalar_lea.vmem %s999_s17, 128  ;;  %s1009_s21 = int_to_ptr.vmem [resolvable:$true] %s1008_s21 }
  0x37   :  { %128 = vmatpush1.msra.mxu0 %v1385_v4  ;;  %239 = vmatpush1.msra.mxu1 %v1385_v4  ;;  %v1419_v14 = vld [vmem:[#allocation10 + $0x20] sm:$0xff]  ;;  %v1423_v15 = vld [vmem:[#allocation10 + $0x18] sm:$0xff]  ;;  %v1427_v16 = vld [vmem:[#allocation10 + $0x10] sm:$0xff]  ;;  %p1247_p6 = scmp.ne.s32.totalorder %s999_s17, %s1246_s22  ;;  %p1251_p7 = scmp.lt.s32.totalorder %s999_s17, %s999_s17 }
  0x38   :  { %129 = vmatprep.subr.mxu0 %v1389_v5  ;;  %240 = vmatprep.subr.mxu1 %v1389_v5  ;;  %v1431_v17 = vld [vmem:[#allocation10 + $0x8] sm:$0xff]  ;;  %v1435_v18 = vld [vmem:[#allocation10] sm:$0xff]  ;;  %v103_v21 = vld [vmem:[#allocation4] sm:$0xff]  ;;  %p1252_p8 = scmp.lt.s32.totalorder %s1246_s22, %s1246_s22 }
  0x39   :  { %130 = vmatpush1.msra.mxu0 %v1393_v6  ;;  %241 = vmatpush1.msra.mxu1 %v1393_v6  ;;  %v104_v25 = vld [vmem:[#allocation4 + $0x8] sm:$0xff]  ;;  %v216_v44 = vld [vmem:[#allocation4 + $0x10] sm:$0xff]  ;;  %v217_v48 = vld [vmem:[#allocation4 + $0x18] sm:$0xff] }
  0x3a   :  { %131 = vmatprep.subr.mxu0 %v1397_v7  ;;  %242 = vmatprep.subr.mxu1 %v1397_v7  ;;  %p1253_p9 = por %p1252_p8, %p1251_p7 }
  0x3b   :  { %132 = vmatpush1.msra.mxu0 %v1401_v8  ;;  %243 = vmatpush1.msra.mxu1 %v1401_v8 }
  0x3c   :  { %133 = vmatprep.subr.mxu0 %v1405_v11  ;;  %244 = vmatprep.subr.mxu1 %v1405_v11  ;;  %p1254_p10 = pnand %p1253_p9, %p1247_p6 }
  0x3d   :  { %134 = vmatpush1.msra.mxu0 %v1411_v12  ;;  %245 = vmatpush1.msra.mxu1 %v1411_v12  ;;  %v99_v19 = vld [vmem:[#allocation3] sm:$0xff]  ;;  %v98_v20 = vld [vmem:[#allocation2] sm:$0xff] }
  0x3e   :  { %135 = vmatprep.subr.mxu0 %v1415_v13  ;;  %246 = vmatprep.subr.mxu1 %v1415_v13 }
  0x3f   :  { %136 = vmatpush1.msra.mxu0 %v1419_v14  ;;  %247 = vmatpush1.msra.mxu1 %v1419_v14 }
  0x40   :  { %137 = vmatprep.subr.mxu0 %v1423_v15  ;;  %248 = vmatprep.subr.mxu1 %v1423_v15 }
  0x41   :  { %138 = vmatpush1.msra.mxu0 %v1427_v16  ;;  %196 = vrot.lane.b32.xlu0 %v99_v19, %s1323_s2  ;;  %v324_v19 = vld [vmem:[#allocation4 + $0x20] sm:$0xff] }
  0x42   :  { %139 = vmatprep.subr.mxu0 %v1431_v17  ;;  %249 = vmatpush1.msra.mxu1 %v1427_v16 }
  0x43   :  { %140 = vmatpush1.msra.mxu0 %v1435_v18  ;;  %250 = vmatprep.subr.mxu1 %v1431_v17 }
  0x44   :  { %1033 = vmatmul.mubr.msk.f32.vlgmr.msra.gmra.mxu0 %vm78_vm0, %v98_v20  ;;  %251 = vmatpush1.msra.mxu1 %v1435_v18 }
  0x45   :  { %344 = vmatprep.subr.mxu0 %v1378_v1  ;;  %392 = vmatprep.mubr.f32.mxu0 %v1322_v0 }
  0x46   :  { %345 = vmatpush1.msra.mxu0 %v1380_v2  ;;  %452 = vmatprep.subr.mxu1 %v1378_v1 }
  0x47   :  { %346 = vmatprep.subr.mxu0 %v1382_v3 }
  0x48   :  { %347 = vmatpush1.msra.mxu0 %v1385_v4 }
  0x49   :  { %348 = vmatprep.subr.mxu0 %v1389_v5 }
  0x4a   :  { %349 = vmatpush1.msra.mxu0 %v1393_v6 }
  0x4b   :  { %350 = vmatprep.subr.mxu0 %v1397_v7 }
  0x4c   :  { %351 = vmatpush1.msra.mxu0 %v1401_v8 }
  0x4d   :  { %352 = vmatprep.subr.mxu0 %v1405_v11 }
  0x4e   :  { %353 = vmatpush1.msra.mxu0 %v1411_v12 }
  0x4f   :  { %354 = vmatprep.subr.mxu0 %v1415_v13 }
  0x50   :  { %355 = vmatpush1.msra.mxu0 %v1419_v14 }
  0x51   :  { %356 = vmatprep.subr.mxu0 %v1423_v15 }
  0x52   :  { %357 = vmatpush1.msra.mxu0 %v1427_v16 }
  0x53   :  { %358 = vmatprep.subr.mxu0 %v1431_v17 }
  0x54   :  { %359 = vmatpush1.msra.mxu0 %v1435_v18 }
  0x55   :  { %560 = vmatprep.subr.mxu0 %v1378_v1 }
  0xb3   :  { %v197_v35 = vpop.permute.xlu0 %196 }
 0x104   :  { %v175_v22 = vpop.f32.mrf.mxu0 }
 0x105   :  { %v180_v23 = vadd.f32 %v175_v22, %v103_v21 }
 0x106   :  { %v177_v26 = vpop.f32.mrf.mxu0 }
 0x107   :  { %v1034_v24 = vmul.f32 -1.442695, %v180_v23  ;;  %v181_v27 = vadd.f32 %v177_v26, %v104_v25  ;;  %v325_v23 = vld [vmem:[#allocation4 + $0x28] sm:$0xff] }
 0x109   :  { %1070 = vpow2.f32 %v1034_v24  ;;  %v1035_v33 = vmul.f32 -1.442695, %v181_v27 }
 0x10a   :  { %1072 = vtanh.f32 %v181_v27 }
 0x116   :  { %v1071_v28 = vpop.eup %1070 }
 0x117   :  { %v185_v29 = vadd.f32 1.0, %v1071_v28  ;;  %v1073_v30 = vpop.eup %1072 }
 0x119   :  { %1074 = vrcp.f32 %v185_v29 }
 0x11a   :  { %1076 = vpow2.f32 %v1035_v33 }
 0x126   :  { %v1075_v31 = vpop.eup %1074 }
 0x127   :  { %v200_v32 = vmul.f32 %v1075_v31, %v1073_v30  ;;  %v1077_v34 = vpop.eup %1076  ;;  %v199_v37 = vmul.f32 %v1075_v31, %v197_v35 }
 0x128   :  { %v192_v36 = vadd.f32 1.0, %v1077_v34 }
 0x129   :  { %202 = vrot.lane.b32.xlu0 %v200_v32, %s1323_s2 }
 0x12a   :  { %1078 = vrcp.f32 %v192_v36 }
 0x137   :  { %v1079_v40 = vpop.eup %1078 }
 0x19b   :  { %v203_v38 = vpop.permute.xlu0 %202 }
 0x19c   :  { %v205_v39 = vadd.f32 %v203_v38, %v199_v37 }
 0x19e   :  { %1080 = vtanh.f32 %v205_v39 }
 0x1ab   :  { %v1081_v41 = vpop.eup %1080 }
 0x1ac   :  { %v207_v42 = vmul.f32 %v1081_v41, %v1079_v40  ;;  %v432_v41 = vld [vmem:[#allocation4 + $0x30] sm:$0xff] }
 0x1ae   :  { %209 = vrot.lane.b32.xlu1 %v207_v42, %s1323_s2 }
 0x220   :  { %v210_v43 = vpop.permute.xlu1 %209 }
 0x221   :  { %212 = vst.msk [vmem:[#allocation12] sm:$0xff] %vm78_vm0, %v210_v43  ;;  %1036 = vmatmul.mubr.msk.f32.vlgmr.msra.gmra.mxu1 %vm78_vm0, %v210_v43 }
 0x222   :  { %453 = vmatpush1.msra.mxu1 %v1380_v2  ;;  %500 = vmatprep.mubr.f32.mxu1 %v1322_v0 }
 0x223   :  { %454 = vmatprep.subr.mxu1 %v1382_v3 }
 0x224   :  { %455 = vmatpush1.msra.mxu1 %v1385_v4 }
 0x225   :  { %456 = vmatprep.subr.mxu1 %v1389_v5 }
 0x226   :  { %457 = vmatpush1.msra.mxu1 %v1393_v6 }
 0x227   :  { %458 = vmatprep.subr.mxu1 %v1397_v7 }
 0x228   :  { %459 = vmatpush1.msra.mxu1 %v1401_v8 }
 0x229   :  { %460 = vmatprep.subr.mxu1 %v1405_v11 }
 0x22a   :  { %461 = vmatpush1.msra.mxu1 %v1411_v12 }
 0x22b   :  { %462 = vmatprep.subr.mxu1 %v1415_v13 }
 0x22c   :  { %463 = vmatpush1.msra.mxu1 %v1419_v14 }
 0x22d   :  { %464 = vmatprep.subr.mxu1 %v1423_v15 }
 0x22e   :  { %465 = vmatpush1.msra.mxu1 %v1427_v16 }
 0x22f   :  { %466 = vmatprep.subr.mxu1 %v1431_v17 }
 0x230   :  { %467 = vmatpush1.msra.mxu1 %v1435_v18 }
 0x231   :  { %668 = vmatprep.subr.mxu1 %v1378_v1 }
 0x2e1   :  { %v286_v45 = vpop.f32.mrf.mxu1 }
 0x2e2   :  { %v291_v46 = vadd.f32 %v286_v45, %v216_v44  ;;  %v433_v45 = vld [vmem:[#allocation4 + $0x38] sm:$0xff] }
 0x2e3   :  { %v288_v49 = vpop.f32.mrf.mxu1 }
 0x2e4   :  { %v1037_v47 = vmul.f32 -1.442695, %v291_v46  ;;  %v292_v50 = vadd.f32 %v288_v49, %v217_v48 }
 0x2e6   :  { %1082 = vpow2.f32 %v1037_v47  ;;  %v1038_v56 = vmul.f32 -1.442695, %v292_v50 }
 0x2e7   :  { %1084 = vtanh.f32 %v292_v50 }
 0x2f3   :  { %v1083_v51 = vpop.eup %1082 }
 0x2f4   :  { %v296_v52 = vadd.f32 1.0, %v1083_v51  ;;  %v1085_v53 = vpop.eup %1084 }
 0x2f6   :  { %1086 = vrcp.f32 %v296_v52 }
 0x2f7   :  { %1088 = vpow2.f32 %v1038_v56 }
 0x303   :  { %v1087_v54 = vpop.eup %1086 }
 0x304   :  { %v307_v55 = vmul.f32 %v1087_v54, %v1085_v53  ;;  %v1089_v57 = vpop.eup %1088  ;;  %v306_v59 = vmul.f32 %v1087_v54, %v205_v39 }
 0x305   :  { %v303_v58 = vadd.f32 1.0, %v1089_v57 }
 0x306   :  { %309 = vrot.lane.b32.xlu1 %v307_v55, %s1323_s2 }
 0x307   :  { %1090 = vrcp.f32 %v303_v58 }
 0x314   :  { %v1091_v62 = vpop.eup %1090 }
 0x378   :  { %v310_v60 = vpop.permute.xlu1 %309 }
 0x379   :  { %v312_v61 = vadd.f32 %v310_v60, %v306_v59 }
 0x37b   :  { %1092 = vtanh.f32 %v312_v61 }
 0x388   :  { %v1093_v63 = vpop.eup %1092 }
 0x389   :  { %v314_v9 = vmul.f32 %v1093_v63, %v1091_v62  ;;  %v540_v62 = vld [vmem:[#allocation4 + $0x40] sm:$0xff] }
 0x38b   :  { %316 = vrot.lane.b32.xlu0 %v314_v9, %s1323_s2 }
 0x3fd   :  { %v317_v10 = vpop.permute.xlu0 %316 }
 0x3fe   :  { %320 = vst.msk [vmem:[#allocation12 + $0x8] sm:$0xff] %vm78_vm0, %v317_v10  ;;  %1039 = vmatmul.mubr.msk.f32.vlgmr.msra.gmra.mxu0 %vm78_vm0, %v317_v10 }
 0x3ff   :  { %561 = vmatpush1.msra.mxu0 %v1380_v2  ;;  %608 = vmatprep.mubr.f32.mxu0 %v1322_v0 }
 0x400   :  { %562 = vmatprep.subr.mxu0 %v1382_v3 }
 0x401   :  { %563 = vmatpush1.msra.mxu0 %v1385_v4 }
 0x402   :  { %564 = vmatprep.subr.mxu0 %v1389_v5 }
 0x403   :  { %565 = vmatpush1.msra.mxu0 %v1393_v6 }
 0x404   :  { %566 = vmatprep.subr.mxu0 %v1397_v7 }
 0x405   :  { %567 = vmatpush1.msra.mxu0 %v1401_v8 }
 0x406   :  { %568 = vmatprep.subr.mxu0 %v1405_v11 }
 0x407   :  { %569 = vmatpush1.msra.mxu0 %v1411_v12 }
 0x408   :  { %570 = vmatprep.subr.mxu0 %v1415_v13 }
 0x409   :  { %571 = vmatpush1.msra.mxu0 %v1419_v14 }
 0x40a   :  { %572 = vmatprep.subr.mxu0 %v1423_v15 }
 0x40b   :  { %573 = vmatpush1.msra.mxu0 %v1427_v16 }
 0x40c   :  { %574 = vmatprep.subr.mxu0 %v1431_v17 }
 0x40d   :  { %575 = vmatpush1.msra.mxu0 %v1435_v18 }
 0x40e   :  { %776 = vmatprep.subr.mxu0 %v1378_v1 }
 0x4be   :  { %v394_v20 = vpop.f32.mrf.mxu0 }
 0x4bf   :  { %v399_v21 = vadd.f32 %v394_v20, %v324_v19  ;;  %v541_v19 = vld [vmem:[#allocation4 + $0x48] sm:$0xff] }
 0x4c0   :  { %v396_v24 = vpop.f32.mrf.mxu0 }
 0x4c1   :  { %v1040_v22 = vmul.f32 -1.442695, %v399_v21  ;;  %v400_v25 = vadd.f32 %v396_v24, %v325_v23 }
 0x4c3   :  { %1094 = vpow2.f32 %v1040_v22  ;;  %v1041_v31 = vmul.f32 -1.442695, %v400_v25 }
 0x4c4   :  { %1096 = vtanh.f32 %v400_v25 }
 0x4d0   :  { %v1095_v26 = vpop.eup %1094 }
 0x4d1   :  { %v404_v27 = vadd.f32 1.0, %v1095_v26  ;;  %v1097_v28 = vpop.eup %1096 }
 0x4d3   :  { %1098 = vrcp.f32 %v404_v27 }
 0x4d4   :  { %1100 = vpow2.f32 %v1041_v31 }
 0x4e0   :  { %v1099_v29 = vpop.eup %1098 }
 0x4e1   :  { %v415_v30 = vmul.f32 %v1099_v29, %v1097_v28  ;;  %v1101_v32 = vpop.eup %1100  ;;  %v414_v34 = vmul.f32 %v1099_v29, %v312_v61 }
 0x4e2   :  { %v411_v33 = vadd.f32 1.0, %v1101_v32 }
 0x4e3   :  { %417 = vrot.lane.b32.xlu1 %v415_v30, %s1323_s2 }
 0x4e4   :  { %1102 = vrcp.f32 %v411_v33 }
 0x4f1   :  { %v1103_v37 = vpop.eup %1102 }
 0x555   :  { %v418_v35 = vpop.permute.xlu1 %417 }
 0x556   :  { %v420_v36 = vadd.f32 %v418_v35, %v414_v34 }
 0x558   :  { %1104 = vtanh.f32 %v420_v36 }
 0x565   :  { %v1105_v38 = vpop.eup %1104 }
 0x566   :  { %v422_v39 = vmul.f32 %v1105_v38, %v1103_v37 }
 0x568   :  { %424 = vrot.lane.b32.xlu0 %v422_v39, %s1323_s2 }
 0x5da   :  { %v425_v40 = vpop.permute.xlu0 %424 }
 0x5db   :  { %428 = vst.msk [vmem:[#allocation12 + $0x10] sm:$0xff] %vm78_vm0, %v425_v40  ;;  %1042 = vmatmul.mubr.msk.f32.vlgmr.msra.gmra.mxu1 %vm78_vm0, %v425_v40 }
 0x5dc   :  { %669 = vmatpush1.msra.mxu1 %v1380_v2  ;;  %716 = vmatprep.mubr.f32.mxu1 %v1322_v0 }
 0x5dd   :  { %670 = vmatprep.subr.mxu1 %v1382_v3 }
 0x5de   :  { %671 = vmatpush1.msra.mxu1 %v1385_v4 }
 0x5df   :  { %672 = vmatprep.subr.mxu1 %v1389_v5 }
 0x5e0   :  { %673 = vmatpush1.msra.mxu1 %v1393_v6 }
 0x5e1   :  { %674 = vmatprep.subr.mxu1 %v1397_v7 }
 0x5e2   :  { %675 = vmatpush1.msra.mxu1 %v1401_v8 }
 0x5e3   :  { %676 = vmatprep.subr.mxu1 %v1405_v11 }
 0x5e4   :  { %677 = vmatpush1.msra.mxu1 %v1411_v12 }
 0x5e5   :  { %678 = vmatprep.subr.mxu1 %v1415_v13 }
 0x5e6   :  { %679 = vmatpush1.msra.mxu1 %v1419_v14 }
 0x5e7   :  { %680 = vmatprep.subr.mxu1 %v1423_v15 }
 0x5e8   :  { %681 = vmatpush1.msra.mxu1 %v1427_v16 }
 0x5e9   :  { %682 = vmatprep.subr.mxu1 %v1431_v17 }
 0x5ea   :  { %683 = vmatpush1.msra.mxu1 %v1435_v18 }
 0x5eb   :  { %884 = vmatprep.subr.mxu1 %v1378_v1 }
 0x69b   :  { %v502_v42 = vpop.f32.mrf.mxu1 }
 0x69c   :  { %v507_v43 = vadd.f32 %v502_v42, %v432_v41 }
 0x69d   :  { %v504_v46 = vpop.f32.mrf.mxu1 }
 0x69e   :  { %v1043_v44 = vmul.f32 -1.442695, %v507_v43  ;;  %v508_v47 = vadd.f32 %v504_v46, %v433_v45  ;;  %v756_v43 = vld [vmem:[#allocation4 + $0x60] sm:$0xff] }
 0x6a0   :  { %1106 = vpow2.f32 %v1043_v44  ;;  %v1044_v53 = vmul.f32 -1.442695, %v508_v47 }
 0x6a1   :  { %1108 = vtanh.f32 %v508_v47  ;;  %v757_v47 = vld [vmem:[#allocation4 + $0x68] sm:$0xff] }
 0x6ad   :  { %v1107_v48 = vpop.eup %1106 }
 0x6ae   :  { %v512_v49 = vadd.f32 1.0, %v1107_v48  ;;  %v1109_v50 = vpop.eup %1108 }
 0x6b0   :  { %1110 = vrcp.f32 %v512_v49 }
 0x6b1   :  { %1112 = vpow2.f32 %v1044_v53 }
 0x6bd   :  { %v1111_v51 = vpop.eup %1110 }
 0x6be   :  { %v523_v52 = vmul.f32 %v1111_v51, %v1109_v50  ;;  %v1113_v1 = vpop.eup %1112  ;;  %v522_v55 = vmul.f32 %v1111_v51, %v420_v36 }
 0x6bf   :  { %v519_v54 = vadd.f32 1.0, %v1113_v1 }
 0x6c0   :  { %525 = vrot.lane.b32.xlu1 %v523_v52, %s1323_s2 }
 0x6c1   :  { %1114 = vrcp.f32 %v519_v54 }
 0x6ce   :  { %v1115_v58 = vpop.eup %1114 }
 0x732   :  { %v526_v56 = vpop.permute.xlu1 %525 }
 0x733   :  { %v528_v57 = vadd.f32 %v526_v56, %v522_v55 }
 0x735   :  { %1116 = vtanh.f32 %v528_v57 }
 0x742   :  { %v1117_v59 = vpop.eup %1116 }
 0x743   :  { %v530_v60 = vmul.f32 %v1117_v59, %v1115_v58 }
 0x745   :  { %532 = vrot.lane.b32.xlu0 %v530_v60, %s1323_s2 }
 0x7b7   :  { %v533_v61 = vpop.permute.xlu0 %532 }
 0x7b8   :  { %536 = vst.msk [vmem:[#allocation12 + $0x18] sm:$0xff] %vm78_vm0, %v533_v61  ;;  %1045 = vmatmul.mubr.msk.f32.vlgmr.msra.gmra.mxu0 %vm78_vm0, %v533_v61 }
 0x7b9   :  { %777 = vmatpush1.msra.mxu0 %v1380_v2  ;;  %824 = vmatprep.mubr.f32.mxu0 %v1322_v0 }
 0x7ba   :  { %778 = vmatprep.subr.mxu0 %v1382_v3 }
 0x7bb   :  { %779 = vmatpush1.msra.mxu0 %v1385_v4 }
 0x7bc   :  { %780 = vmatprep.subr.mxu0 %v1389_v5 }
 0x7bd   :  { %781 = vmatpush1.msra.mxu0 %v1393_v6 }
 0x7be   :  { %782 = vmatprep.subr.mxu0 %v1397_v7 }
 0x7bf   :  { %783 = vmatpush1.msra.mxu0 %v1401_v8 }
 0x7c0   :  { %784 = vmatprep.subr.mxu0 %v1405_v11 }
 0x7c1   :  { %785 = vmatpush1.msra.mxu0 %v1411_v12 }
 0x7c2   :  { %786 = vmatprep.subr.mxu0 %v1415_v13 }
 0x7c3   :  { %787 = vmatpush1.msra.mxu0 %v1419_v14 }
 0x7c4   :  { %788 = vmatprep.subr.mxu0 %v1423_v15 }
 0x7c5   :  { %789 = vmatpush1.msra.mxu0 %v1427_v16 }
 0x7c6   :  { %790 = vmatprep.subr.mxu0 %v1431_v17 }
 0x7c7   :  { %791 = vmatpush1.msra.mxu0 %v1435_v18 }
 0x878   :  { %v610_v63 = vpop.f32.mrf.mxu0 }
 0x879   :  { %v615_v9 = vadd.f32 %v610_v63, %v540_v62 }
 0x87a   :  { %v612_v20 = vpop.f32.mrf.mxu0 }
 0x87b   :  { %v1046_v10 = vmul.f32 -1.442695, %v615_v9  ;;  %v616_v21 = vadd.f32 %v612_v20, %v541_v19  ;;  %v864_v9 = vld [vmem:[#allocation4 + $0x70] sm:$0xff] }
 0x87d   :  { %1118 = vpow2.f32 %v1046_v10  ;;  %v1047_v27 = vmul.f32 -1.442695, %v616_v21 }
 0x87e   :  { %1120 = vtanh.f32 %v616_v21  ;;  %v865_v21 = vld [vmem:[#allocation4 + $0x78] sm:$0xff] }
 0x88a   :  { %v1119_v22 = vpop.eup %1118 }
 0x88b   :  { %v620_v23 = vadd.f32 1.0, %v1119_v22  ;;  %v1121_v24 = vpop.eup %1120 }
 0x88d   :  { %1122 = vrcp.f32 %v620_v23 }
 0x88e   :  { %1124 = vpow2.f32 %v1047_v27 }
 0x89a   :  { %v1123_v25 = vpop.eup %1122 }
 0x89b   :  { %v631_v26 = vmul.f32 %v1123_v25, %v1121_v24  ;;  %v1125_v28 = vpop.eup %1124  ;;  %v630_v30 = vmul.f32 %v1123_v25, %v528_v57 }
 0x89c   :  { %v627_v29 = vadd.f32 1.0, %v1125_v28 }
 0x89d   :  { %633 = vrot.lane.b32.xlu1 %v631_v26, %s1323_s2 }
 0x89e   :  { %1126 = vrcp.f32 %v627_v29 }
 0x8ab   :  { %v1127_v33 = vpop.eup %1126 }
 0x90f   :  { %v634_v31 = vpop.permute.xlu1 %633 }
 0x910   :  { %v636_v32 = vadd.f32 %v634_v31, %v630_v30 }
 0x912   :  { %1128 = vtanh.f32 %v636_v32 }
 0x91f   :  { %v1129_v34 = vpop.eup %1128 }
 0x920   :  { %v638_v35 = vmul.f32 %v1129_v34, %v1127_v33 }
 0x922   :  { %640 = vrot.lane.b32.xlu0 %v638_v35, %s1323_s2 }
 0x994   :  { %v641_v36 = vpop.permute.xlu0 %640 }
 0x995   :  { %644 = vst.msk [vmem:[#allocation12 + $0x20] sm:$0xff] %vm78_vm0, %v641_v36  ;;  %1048 = vmatmul.mubr.msk.f32.vlgmr.msra.gmra.mxu1 %vm78_vm0, %v641_v36 }
 0x996   :  { %885 = vmatpush1.msra.mxu1 %v1380_v2  ;;  %932 = vmatprep.mubr.f32.mxu1 %v1322_v0  ;;  %v648_v0 = vld [vmem:[#allocation4 + $0x50] sm:$0xff] }
 0x997   :  { %886 = vmatprep.subr.mxu1 %v1382_v3 }
 0x998   :  { %887 = vmatpush1.msra.mxu1 %v1385_v4 }
 0x999   :  { %888 = vmatprep.subr.mxu1 %v1389_v5  ;;  %v649_v5 = vld [vmem:[#allocation4 + $0x58] sm:$0xff] }
 0x99a   :  { %889 = vmatpush1.msra.mxu1 %v1393_v6 }
 0x99b   :  { %890 = vmatprep.subr.mxu1 %v1397_v7 }
 0x99c   :  { %891 = vmatpush1.msra.mxu1 %v1401_v8 }
 0x99d   :  { %892 = vmatprep.subr.mxu1 %v1405_v11 }
 0x99e   :  { %893 = vmatpush1.msra.mxu1 %v1411_v12 }
 0x99f   :  { %894 = vmatprep.subr.mxu1 %v1415_v13 }
 0x9a0   :  { %895 = vmatpush1.msra.mxu1 %v1419_v14 }
 0x9a1   :  { %896 = vmatprep.subr.mxu1 %v1423_v15 }
 0x9a2   :  { %897 = vmatpush1.msra.mxu1 %v1427_v16 }
 0x9a3   :  { %898 = vmatprep.subr.mxu1 %v1431_v17 }
 0x9a4   :  { %899 = vmatpush1.msra.mxu1 %v1435_v18 }
 0xa55   :  { %v718_v2 = vpop.f32.mrf.mxu1 }
 0xa56   :  { %v723_v3 = vadd.f32 %v718_v2, %v648_v0 }
 0xa57   :  { %v720_v6 = vpop.f32.mrf.mxu1 }
 0xa58   :  { %v1049_v4 = vmul.f32 -1.442695, %v723_v3  ;;  %v724_v7 = vadd.f32 %v720_v6, %v649_v5 }
 0xa5a   :  { %1130 = vpow2.f32 %v1049_v4  ;;  %v1050_v15 = vmul.f32 -1.442695, %v724_v7 }
 0xa5b   :  { %1132 = vtanh.f32 %v724_v7 }
 0xa67   :  { %v1131_v8 = vpop.eup %1130 }
 0xa68   :  { %v728_v11 = vadd.f32 1.0, %v1131_v8  ;;  %v1133_v12 = vpop.eup %1132 }
 0xa6a   :  { %1134 = vrcp.f32 %v728_v11 }
 0xa6b   :  { %1136 = vpow2.f32 %v1050_v15 }
 0xa77   :  { %v1135_v13 = vpop.eup %1134 }
 0xa78   :  { %v739_v14 = vmul.f32 %v1135_v13, %v1133_v12  ;;  %v1137_v16 = vpop.eup %1136  ;;  %v738_v18 = vmul.f32 %v1135_v13, %v636_v32 }
 0xa79   :  { %v735_v17 = vadd.f32 1.0, %v1137_v16 }
 0xa7a   :  { %741 = vrot.lane.b32.xlu1 %v739_v14, %s1323_s2 }
 0xa7b   :  { %1138 = vrcp.f32 %v735_v17 }
 0xa88   :  { %v1139_v39 = vpop.eup %1138 }
 0xaec   :  { %v742_v37 = vpop.permute.xlu1 %741 }
 0xaed   :  { %v744_v38 = vadd.f32 %v742_v37, %v738_v18 }
 0xaef   :  { %1140 = vtanh.f32 %v744_v38 }
 0xafc   :  { %v1141_v40 = vpop.eup %1140 }
 0xafd   :  { %v746_v41 = vmul.f32 %v1141_v40, %v1139_v39 }
 0xaff   :  { %748 = vrot.lane.b32.xlu0 %v746_v41, %s1323_s2 }
 0xb71   :  { %v749_v42 = vpop.permute.xlu0 %748 }
 0xb72   :  { %752 = vst.msk [vmem:[#allocation12 + $0x28] sm:$0xff] %vm78_vm0, %v749_v42  ;;  %1051 = vmatmul.mubr.msk.f32.vlgmr.msra.gmra.mxu0 %vm78_vm0, %v749_v42 }
 0xc32   :  { %v826_v44 = vpop.f32.mrf.mxu0 }
 0xc33   :  { %v831_v45 = vadd.f32 %v826_v44, %v756_v43 }
 0xc34   :  { %v828_v48 = vpop.f32.mrf.mxu0 }
 0xc35   :  { %v1052_v46 = vmul.f32 -1.442695, %v831_v45  ;;  %v832_v49 = vadd.f32 %v828_v48, %v757_v47 }
 0xc37   :  { %1142 = vpow2.f32 %v1052_v46  ;;  %v1053_v54 = vmul.f32 -1.442695, %v832_v49 }
 0xc38   :  { %1144 = vtanh.f32 %v832_v49 }
 0xc44   :  { %v1143_v50 = vpop.eup %1142 }
 0xc45   :  { %v836_v51 = vadd.f32 1.0, %v1143_v50  ;;  %v1145_v52 = vpop.eup %1144 }
 0xc47   :  { %1146 = vrcp.f32 %v836_v51 }
 0xc48   :  { %1148 = vpow2.f32 %v1053_v54 }
 0xc54   :  { %v1147_v53 = vpop.eup %1146 }
 0xc55   :  { %v847_v1 = vmul.f32 %v1147_v53, %v1145_v52  ;;  %v1149_v55 = vpop.eup %1148  ;;  %v846_v57 = vmul.f32 %v1147_v53, %v744_v38 }
 0xc56   :  { %v843_v56 = vadd.f32 1.0, %v1149_v55 }
 0xc57   :  { %849 = vrot.lane.b32.xlu1 %v847_v1, %s1323_s2 }
 0xc58   :  { %1150 = vrcp.f32 %v843_v56 }
 0xc65   :  { %v1151_v60 = vpop.eup %1150 }
 0xcc9   :  { %v850_v58 = vpop.permute.xlu1 %849 }
 0xcca   :  { %v852_v59 = vadd.f32 %v850_v58, %v846_v57 }
 0xccc   :  { %1152 = vtanh.f32 %v852_v59 }
 0xcd9   :  { %v1153_v61 = vpop.eup %1152 }
 0xcda   :  { %v854_v62 = vmul.f32 %v1153_v61, %v1151_v60 }
 0xcdc   :  { %856 = vrot.lane.b32.xlu0 %v854_v62, %s1323_s2 }
 0xd4e   :  { %v857_v63 = vpop.permute.xlu0 %856 }
 0xd4f   :  { %860 = vst.msk [vmem:[#allocation12 + $0x30] sm:$0xff] %vm78_vm0, %v857_v63  ;;  %1054 = vmatmul.mubr.msk.f32.vlgmr.msra.gmra.mxu1 %vm78_vm0, %v857_v63 }
 0xe0f   :  { %v934_v10 = vpop.f32.mrf.mxu1 }
 0xe10   :  { %v939_v19 = vadd.f32 %v934_v10, %v864_v9 }
 0xe11   :  { %v936_v22 = vpop.f32.mrf.mxu1 }
 0xe12   :  { %v1055_v20 = vmul.f32 -1.442695, %v939_v19  ;;  %v940_v23 = vadd.f32 %v936_v22, %v865_v21 }
 0xe14   :  { %1154 = vpow2.f32 %v1055_v20  ;;  %v1056_v29 = vmul.f32 -1.442695, %v940_v23 }
 0xe15   :  { %1156 = vtanh.f32 %v940_v23 }
 0xe21   :  { %v1155_v24 = vpop.eup %1154 }
 0xe22   :  { %v944_v25 = vadd.f32 1.0, %v1155_v24  ;;  %v1157_v26 = vpop.eup %1156 }
 0xe24   :  { %1158 = vrcp.f32 %v944_v25 }
 0xe25   :  { %1160 = vpow2.f32 %v1056_v29 }
 0xe31   :  { %v1159_v27 = vpop.eup %1158 }
 0xe32   :  { %v955_v28 = vmul.f32 %v1159_v27, %v1157_v26  ;;  %v1161_v30 = vpop.eup %1160  ;;  %v954_v32 = vmul.f32 %v1159_v27, %v852_v59 }
 0xe33   :  { %v951_v31 = vadd.f32 1.0, %v1161_v30 }
 0xe34   :  { %957 = vrot.lane.b32.xlu1 %v955_v28, %s1323_s2 }
 0xe35   :  { %1162 = vrcp.f32 %v951_v31 }
 0xe42   :  { %v1163_v35 = vpop.eup %1162 }
 0xea6   :  { %v958_v33 = vpop.permute.xlu1 %957 }
 0xea7   :  { %v960_v34 = vadd.f32 %v958_v33, %v954_v32 }
 0xea9   :  { %1164 = vtanh.f32 %v960_v34  ;;  %971 = vrot.lane.b32.xlu1 %v960_v34, %s1323_s2 }
 0xeb6   :  { %v1165_v36 = vpop.eup %1164 }
 0xeb7   :  { %v962_v0 = vmul.f32 %v1165_v36, %v1163_v35 }
 0xeb9   :  { %964 = vrot.lane.b32.xlu0 %v962_v0, %s1323_s2 }
 0xf1b   :  { %v972_v2 = vpop.permute.xlu1 %971 }
 0xf1c   :  { %974 = vst.msk [vmem:[#allocation3] sm:$0xff] %vm78_vm0, %v972_v2  ;;  %979 = vst.msk [vmem:[#allocation15] sm:$0xff] %vm78_vm0, %v972_v2 }
 0xf2b   :  { %v965_v3 = vpop.permute.xlu0 %964 }
 0xf2c   :  { %968 = vst.msk [vmem:[#allocation12 + $0x38] sm:$0xff] %vm78_vm0, %v965_v3  ;;  %969 = vst.msk [vmem:[#allocation2] sm:$0xff] %vm78_vm0, %v965_v3 }
 0xf2d   :  { %978 = vst.msk [vmem:[#allocation13] sm:$0xff] %vm78_vm0, %v965_v3 }
 0xf2e   :  { %1257 = shalt.err (!%p1254_p10)
}
 0xf2f   :  { %1001 = dma.vmem_to_hbm [thread:$0]  %s999_s17, 128, %s1598_s5, [#allocation14]  }
 0xf30   :  { %s1266_s25 = scalar_lea.vmem %s986_s19, 1024  ;;  %p1271_p12 = scmp.lt.s32.totalorder %s986_s19, %s986_s19 }
 0xf31   :  { %p1267_p11 = scmp.ne.s32.totalorder %s986_s19, %s1266_s25  ;;  %p1272_p13 = scmp.lt.s32.totalorder %s1266_s25, %s1266_s25 }
 0xf33   :  { %p1273_p0 = por %p1272_p13, %p1271_p12 }
 0xf35   :  { %p1274_p1 = pnand %p1273_p0, %p1267_p11 }
 0xf37   :  { %1277 = shalt.err (!%p1274_p1)
}
 0xf38   :  { %s1327_s26 = smov 128   ;;  %s1328_s27 = smov 8  }
 0xf39   :  { %991 = dma.vmem_to_hbm [thread:$0]  %s986_s19, 1024, %s1597_s4, [#allocation6], %s1327_s26, %s1327_s26, %s1328_s27  }
 0xf3a   :  { %s1286_s30 = scalar_lea.vmem %s1009_s21, 128  ;;  %p1291_p3 = scmp.lt.s32.totalorder %s1009_s21, %s1009_s21 }
 0xf3b   :  { %p1287_p2 = scmp.ne.s32.totalorder %s1009_s21, %s1286_s30  ;;  %p1292_p4 = scmp.lt.s32.totalorder %s1286_s30, %s1286_s30 }
 0xf3d   :  { %p1293_p5 = por %p1292_p4, %p1291_p3 }
 0xf3f   :  { %p1294_p6 = pnand %p1293_p5, %p1287_p2 }
 0xf41   :  { %1297 = shalt.err (!%p1294_p6)
}
 0xf42   :  { %1011 = dma.vmem_to_hbm [thread:$0]  %s1009_s21, 128, %s1599_s6, [#allocation14]  }
 0xf43   :  { %1312 = dma.done.wait [#allocation6], 1024  }
 0xf44   :  { %1313 = vsyncadd [#allocation6], 4294966272 }
 0xf45   :  { %1314 = dma.done.wait [#allocation14], 256  }
 0xf46   :  { %1315 = vsyncadd [#allocation14], 4294967040 }
 0xf47   :  { %1021 = vsyncpa [#allocation5], 1 }
 0xf48   :  { %1022 = vsyncpa [#allocation8], 1 }
 0xf49   :  { %1023 = vsyncpa [#allocation11], 1 }
 0xf4a   :  { %1024 = vsyncpa [#allocation6], 1 }
 0xf4b   :  { %1025 = vsyncpa [#allocation14], 1 }

</bundles_post_ra>
